<compile_context>
chip_gen: v5e
topology: v5e:2x2
jax: 0.10.0
libtpu: 0.0.40
codegen_flags: <defaults>
</compile_context>

<pallas_src>
import numpy as np
import jax
import jax.numpy as jnp
from jax.experimental import pallas as pl
from jax.experimental.pallas import tpu as pltpu


# ----------------------------------------------------------------------------
# Constant-operator construction (numpy float64, once at trace time)
# ----------------------------------------------------------------------------

def _filt_1d(filt_size):
    # Binomial filter exactly as in Downsample.__init__ (normalized).
    table = {
        1: [1.0],
        2: [1.0, 1.0],
        3: [1.0, 2.0, 1.0],
        4: [1.0, 3.0, 3.0, 1.0],
        5: [1.0, 4.0, 6.0, 4.0, 1.0],
        6: [1.0, 5.0, 10.0, 10.0, 5.0, 1.0],
        7: [1.0, 6.0, 15.0, 20.0, 15.0, 6.0, 1.0],
    }
    a = np.array(table[filt_size], dtype=np.float64)
    return a / a.sum()


def _band_matrix(out_len, in_len, a, stride):
    # S[i, stride*i + k] = a[k]  ->  (S @ v) blurs + downsamples along the leading axis.
    S = np.zeros((out_len, in_len), dtype=np.float64)
    k = a.shape[0]
    for i in range(out_len):
        S[i, i * stride: i * stride + k] = a
    return S


def _pad_matrix(n, pad_lo, pad_hi, mode):
    # Linear padding operator P of shape (n + pad_lo + pad_hi, n): P @ v == pad(v).
    # mode: 'reflect' (ReflectionPad2d), 'edge' (ReplicationPad2d), 'zero' (ZeroPad2d).
    m = n + pad_lo + pad_hi
    P = np.zeros((m, n), dtype=np.float64)
    for i in range(m):
        src = i - pad_lo
        if src < 0:
            if mode == 'reflect':
                src = -src
            elif mode == 'edge':
                src = 0
            else:                 # zero padding: row stays all-zero
                continue
        elif src >= n:
            if mode == 'reflect':
                src = 2 * (n - 1) - src
            elif mode == 'edge':
                src = n - 1
            else:
                continue
        P[i, src] = 1.0
    return P


# ----------------------------------------------------------------------------
# VMEM budgeting / block picking (generation aware)
# ----------------------------------------------------------------------------

def _vmem_capacity_bytes():
    try:
        cap = int(pltpu.get_tpu_info().vmem_capacity_bytes)
        if cap > 0:
            return cap
    except Exception:
        pass
    return 64 * 1024 * 1024      # conservative fallback = v7x per-TensorCore VMEM


def _round_up(x, m):
    return -(-x // m) * m


def _tiled_bytes(rows, cols, itemsize):
    # VMEM footprint of a (rows, cols) tile in the native (sublane, lane) tiling;
    # sublane pack is 8 rows for 32-bit, 16 for 16-bit, 32 for 8-bit dtypes.
    sub = 8 * max(1, 4 // itemsize)
    return _round_up(rows, sub) * _round_up(cols, 128) * itemsize


def _pick_bc(nc, per_ch_bytes, budget_bytes, *, align=1, min_steps=4,
             min_block_bytes=1 << 20):
    """Channels per grid step.  Ragged grid (cdiv), so Bc need not divide nc."""
    per_ch_bytes = max(1, int(per_ch_bytes))
    budget_bytes = max(per_ch_bytes, int(budget_bytes))
    bc = max(1, min(nc, budget_bytes // per_ch_bytes, 1024))
    # Prefer >= min_steps grid steps (>= 2 per v7x TensorCore; DMA/compute overlap on
    # single-core chips) as long as each block stays >= ~1 MiB.
    if -(-nc // bc) < min_steps:
        cand = max(1, -(-nc // min_steps))
        if cand * per_ch_bytes >= min_block_bytes:
            bc = cand
    # 2-D (Kron) path: Bc is the sublane dim of the block -> multiple of pack or == nc.
    if align > 1 and bc != nc:
        bc = max(align, (bc // align) * align)
        if bc >= nc:
            bc = nc
    return int(bc)


# ----------------------------------------------------------------------------
# Kernels
# ----------------------------------------------------------------------------

def _downsample_kron_kernel(x_ref, k_ref, o_ref):
    # x_ref: (Bc, H*W)   k_ref: (H*W, Ho*Wo)   o_ref: (Bc, Ho*Wo)
    # Single lane-dense MXU GEMM; f32 accumulation, no activation upcast.
    o = jnp.dot(x_ref[...], k_ref[...], preferred_element_type=jnp.float32)
    o_ref[...] = o.astype(o_ref.dtype)


def _make_separable_kernel(collapse):
    def kernel(x_ref, sh_ref, swt_ref, o_ref):
        # x_ref: (Bc, H, W)   sh_ref: (Ho, H)   swt_ref: (W, Wo)   o_ref: (Bc, Ho, Wo)
        bc, h, w = x_ref.shape
        ho = sh_ref.shape[0]
        wo = swt_ref.shape[1]

        x = x_ref[...]                 # native dtype (MXU input), f32 accumulation below
        swt = swt_ref[...]

        if collapse:
            # H % sublane_pack == 0 -> the (Bc,H)->(Bc*H) collapse is layout-free:
            # one fused 2-D MXU matmul over the whole channel batch.
            t = jnp.dot(x.reshape(bc * h, w), swt,
                        preferred_element_type=jnp.float32)            # (Bc*H, Wo) f32
            t = t.reshape(bc, h, wo)
        else:
            # Misaligned H: avoid the relayout copy; batched matmul instead.
            swt_b = jnp.broadcast_to(swt[None], (bc, w, wo))
            t = jax.lax.dot_general(x, swt_b, (((2,), (1,)), ((0,), (0,))),
                                    preferred_element_type=jnp.float32)  # (Bc, H, Wo) f32

        # H (row) pass, kept in f32 end-to-end (no bf16 double rounding).
        # NOTE: the broadcast of the small row operator is budgeted in _pick_bc; the
        # broadcast-free alternatives all require major-dim relayouts that cost more.
        sh_b = jnp.broadcast_to(sh_ref[...].astype(jnp.float32)[None], (bc, ho, h))
        o = jax.lax.dot_general(sh_b, t, (((2,), (1,)), ((0,), (0,))),
                                preferred_element_type=jnp.float32)      # (Bc, Ho, Wo)
        o_ref[...] = o.astype(o_ref.dtype)
    return kernel


# ----------------------------------------------------------------------------
# Wrapper
# ----------------------------------------------------------------------------

def downsample(x, pad_type='reflect', filt_size=3, stride=2, pad_off=0):
    N, C, H, W = x.shape
    if x.dtype not in (jnp.float32, jnp.bfloat16, jnp.float16):
        x = x.astype(jnp.float32)
    dt = x.dtype
    isz = jnp.dtype(dt).itemsize
    pack = 8 * max(1, 4 // isz)          # sublane pack: 8 (f32) / 16 (bf16, f16)

    pad_a = int(1.0 * (filt_size - 1) / 2) + pad_off
    pad_b = int(np.ceil(1.0 * (filt_size - 1) / 2)) + pad_off
    mode = {'reflect': 'reflect', 'refl': 'reflect',
            'replicate': 'edge', 'repl': 'edge', 'zero': 'zero'}[pad_type]

    Hp, Wp = H + pad_a + pad_b, W + pad_a + pad_b
    Ho = (Hp - filt_size) // stride + 1
    Wo = (Wp - filt_size) // stride + 1

    # Padding folded into the separable band operators (padding is linear).
    a = _filt_1d(filt_size)
    S_h = _band_matrix(Ho, Hp, a, stride) @ _pad_matrix(H, pad_a, pad_b, mode)   # (Ho, H)
    S_w = _band_matrix(Wo, Wp, a, stride) @ _pad_matrix(W, pad_a, pad_b, mode)   # (Wo, W)

    NC = N * C

    # Generation-aware VMEM budget + matching scoped-VMEM limit.
    cap = _vmem_capacity_bytes()
    budget = int(0.40 * cap)                                  # live blocks target
    vmem_limit = int(min(cap, 128 * 1024 * 1024) * 0.90)      # raise the scoped limit
    cparams = pltpu.CompilerParams(dimension_semantics=("parallel",),
                                   vmem_limit_bytes=vmem_limit)
    scratch_margin = 2 << 20                                  # Mosaic internal scratch

    # ------------------------------------------------------------------ Kron path
    kron_op_bytes = 2 * _tiled_bytes(H * W, Ho * Wo, isz)     # grid-invariant, 2 bufs
    use_kron = (H * W <= 4096) and (kron_op_bytes <= budget // 4)

    if use_kron:
        K = jnp.asarray(np.kron(S_h, S_w).T, dtype=dt)        # (H*W, Ho*Wo)
        xf = x.reshape(NC, H * W)                             # free reshape (row-major)

        per_ch = (2 * _round_up(H * W, 128) * isz             # input block (2 bufs)
                  + 2 * _round_up(Ho * Wo, 128) * isz         # output block (2 bufs)
                  + _round_up(Ho * Wo, 128) * 4)              # f32 GEMM result
        Bc = _pick_bc(NC, per_ch, budget - kron_op_bytes - scratch_margin, align=pack)
        grid = (pl.cdiv(NC, Bc),)

        out = pl.pallas_call(
            _downsample_kron_kernel,
            out_shape=jax.ShapeDtypeStruct((NC, Ho * Wo), dt),
            grid_spec=pltpu.PrefetchScalarGridSpec(
                num_scalar_prefetch=0,
                grid=grid,
                in_specs=[
                    pl.BlockSpec((Bc, H * W), lambda i: (i, 0)),
                    pl.BlockSpec((H * W, Ho * Wo), lambda i: (0, 0)),
                ],
                out_specs=pl.BlockSpec((Bc, Ho * Wo), lambda i: (i, 0)),
            ),
            compiler_params=cparams,
        )(xf, K)
        return out.reshape(N, C, Ho, Wo)

    # ------------------------------------------------------------- Separable path
    S_h_j = jnp.asarray(S_h, dtype=dt)        # (Ho, H)
    S_wT_j = jnp.asarray(S_w.T, dtype=dt)     # (W, Wo)
    xf = x.reshape(NC, H, W)

    per_ch = (2 * _tiled_bytes(H, W, isz)          # input block (2 bufs)
              + 2 * _tiled_bytes(Ho, Wo, isz)      # output block (2 bufs)
              + _tiled_bytes(H, Wo, 4)             # f32 W-pass result
              + _tiled_bytes(Ho, H, 4)             # broadcast row operator (f32)
              + _tiled_bytes(Ho, Wo, 4))           # f32 H-pass result
    fixed = (2 * _tiled_bytes(Ho, H, isz) + 2 * _tiled_bytes(W, Wo, isz)
             + scratch_margin)
    Bc = _pick_bc(NC, per_ch, budget - fixed, align=1)
    grid = (pl.cdiv(NC, Bc),)
    collapse = (H % pack == 0)

    # NOTE: if profiling shows exposed input DMA on v5e/v6e (128 MiB VMEM), the input
    # spec can take pipeline_mode=pl.Buffered(3) for a deeper pipeline.
    out = pl.pallas_call(
        _make_separable_kernel(collapse),
        out_shape=jax.ShapeDtypeStruct((NC, Ho, Wo), dt),
        grid_spec=pltpu.PrefetchScalarGridSpec(
            num_scalar_prefetch=0,
            grid=grid,
            in_specs=[
                pl.BlockSpec((Bc, H, W), lambda i: (i, 0, 0)),
                pl.BlockSpec((Ho, H), lambda i: (0, 0)),
                pl.BlockSpec((W, Wo), lambda i: (0, 0)),
            ],
            out_specs=pl.BlockSpec((Bc, Ho, Wo), lambda i: (i, 0, 0)),
        ),
        compiler_params=cparams,
    )(xf, S_h_j, S_wT_j)
    return out.reshape(N, C, Ho, Wo)


# ----------------------------------------------------------------------------
# Pure-JAX reference (mirrors F.conv2d(self.pad(inp), filt, stride, groups=C))
# ----------------------------------------------------------------------------

def downsample_ref(x, pad_type='reflect', filt_size=3, stride=2, pad_off=0):
    N, C, H, W = x.shape
    pad_a = int(1.0 * (filt_size - 1) / 2) + pad_off
    pad_b = int(np.ceil(1.0 * (filt_size - 1) / 2)) + pad_off
    mode = {'reflect': 'reflect', 'refl': 'reflect',
            'replicate': 'edge', 'repl': 'edge', 'zero': 'constant'}[pad_type]
    xp = jnp.pad(x, ((0, 0), (0, 0), (pad_a, pad_b), (pad_a, pad_b)), mode=mode)
    a = _filt_1d(filt_size)
    f2 = np.outer(a, a)
    w = jnp.asarray(np.tile(f2[None, None], (C, 1, 1, 1)), dtype=jnp.float32)
    return jax.lax.conv_general_dilated(
        xp.astype(jnp.float32), w, (stride, stride), 'VALID',
        dimension_numbers=('NCHW', 'OIHW', 'NCHW'),
        feature_group_count=C)


if __name__ == "__main__":
    key = jax.random.PRNGKey(0)
    x = jax.random.normal(key, (2, 4, 16, 16), dtype=jnp.float32)

    # Main config (Kronecker path), matches the module defaults.
    y = downsample(x, pad_type='reflect', filt_size=3, stride=2, pad_off=0)
    jax.block_until_ready(y)
    assert y.shape == (2, 4, 8, 8), y.shape
    np.testing.assert_allclose(np.asarray(y), np.asarray(downsample_ref(x)),
                               rtol=1e-5, atol=1e-5)

    # Extra configs exercising folded-padding boundary rows (zero / replicate,
    # asymmetric pad, pad_off > 0).
    for kwargs in (dict(pad_type='zero', filt_size=4, stride=2, pad_off=0),
                   dict(pad_type='replicate', filt_size=5, stride=2, pad_off=1)):
        y2 = downsample(x, **kwargs)
        jax.block_until_ready(y2)
        np.testing.assert_allclose(np.asarray(y2), np.asarray(downsample_ref(x, **kwargs)),
                                   rtol=1e-5, atol=1e-5)

    # Larger plane -> separable (two-pass) path.
    x2 = jax.random.normal(jax.random.PRNGKey(0), (1, 2, 72, 72), dtype=jnp.float32)
    y3 = downsample(x2, pad_type='reflect', filt_size=3, stride=2, pad_off=0)
    jax.block_until_ready(y3)
    assert y3.shape == (1, 2, 36, 36), y3.shape
    np.testing.assert_allclose(np.asarray(y3), np.asarray(downsample_ref(x2)),
                               rtol=1e-5, atol=1e-5)

    print("KERNEL_OK")
</pallas_src>

<mosaic_0001>
module attributes {stable_mosaic.version = 11 : i64} {
  func.func @_downsample_kron_kernel(%arg0: i32, %arg1: memref<8x256xf32, #tpu.memory_space<vmem>>, %arg2: memref<256x64xf32, #tpu.memory_space<vmem>>, %arg3: memref<8x64xf32, #tpu.memory_space<vmem>>) attributes {dimension_semantics = [#tpu.dimension_semantics<parallel>], iteration_bounds = array<i64: 1>, scalar_prefetch = 0 : i64, scratch_operands = 0 : i64, tpu.core_type = #tpu.core_type<tc>, window_params = [{transform_indices = @transform_0, window_bounds = array<i64: 8, 256>}, {pipeline_mode = #tpu.pipeline_mode<synchronous>, transform_indices = @transform_1, window_bounds = array<i64: 256, 64>}, {transform_indices = @transform_2, window_bounds = array<i64: 8, 64>}]} {
    %c0 = arith.constant 0 : index
    %c0_0 = arith.constant 0 : index
    %0 = vector.load %arg1[%c0, %c0_0] : memref<8x256xf32, #tpu.memory_space<vmem>>, vector<8x256xf32>
    %c0_1 = arith.constant 0 : index
    %c0_2 = arith.constant 0 : index
    %1 = vector.load %arg2[%c0_1, %c0_2] : memref<256x64xf32, #tpu.memory_space<vmem>>, vector<256x64xf32>
    %cst = arith.constant dense<0.000000e+00> : vector<8x64xf32>
    %2 = tpu.matmul %0, %1, %cst {dimension_numbers = #tpu.dot_dimension_numbers<[1], [0], [0], [1], [0, 0, 1, 1], [], []>} : vector<8x256xf32>, vector<256x64xf32>, vector<8x64xf32> -> vector<8x64xf32>
    %c0_3 = arith.constant 0 : index
    %c0_4 = arith.constant 0 : index
    %3 = vector.load %arg3[%c0_3, %c0_4] : memref<8x64xf32, #tpu.memory_space<vmem>>, vector<8x64xf32>
    tpu.vector_store %arg3[%c0_3, %c0_4], %2 {strides = array<i32>} : memref<8x64xf32, #tpu.memory_space<vmem>>, vector<8x64xf32>,
    return
  }
  func.func @transform_0(%arg0: i32) -> (i32, i32) {
    %c0_i32 = arith.constant 0 : i32
    %c0_i32_0 = arith.constant 0 : i32
    return %arg0, %c0_i32 : i32, i32
  }
  func.func @transform_1(%arg0: i32) -> (i32, i32) {
    %c0_i32 = arith.constant 0 : i32
    %c0_i32_0 = arith.constant 0 : i32
    %c0_i32_1 = arith.constant 0 : i32
    return %c0_i32, %c0_i32_0 : i32, i32
  }
  func.func @transform_2(%arg0: i32) -> (i32, i32) {
    %c0_i32 = arith.constant 0 : i32
    %c0_i32_0 = arith.constant 0 : i32
    return %arg0, %c0_i32 : i32, i32
  }
}

</mosaic_0001>

<bundles_post_ra>
// kernel: tpu_custom_call.1
= control target key start
LH: loop header
LB: loop body
LE: loop exit
PB: predicated region body
PF: predicated region fallthrough
CT: control target
= control target key end

     0   :  { %s252_s0 = inlined_call_operand.vmem [shape: f32[8,256], index: 0, kind: input, shape index: {}]   ;;  %s253_s1 = inlined_call_operand.vmem [shape: f32[256,64], index: 1, kind: input, shape index: {}]   ;;  %s254_s2 = inlined_call_operand.hbm [shape: f32[8,64], index: 2, kind: output, shape index: {}]  }
   0x1   :  { %v29_v0 = vld [vmem:[%s253_s1 + $0x78] sm:$0xff]  ;;  %v28_v2 = vld [vmem:[%s253_s1 + $0x70] sm:$0xff]  ;;  %v27_v4 = vld [vmem:[%s253_s1 + $0x68] sm:$0xff] }
   0x2   :  { %v45_v1 = vld [vmem:[%s253_s1 + $0xf8] sm:$0xff]  ;;  %46 = vmatpush.msra.mxu0 %v29_v0  ;;  %v44_v3 = vld [vmem:[%s253_s1 + $0xf0] sm:$0xff]  ;;  %v43_v5 = vld [vmem:[%s253_s1 + $0xe8] sm:$0xff] }
   0x3   :  { %66 = vmatpush.msra.mxu1 %v45_v1  ;;  %v26_v6 = vld [vmem:[%s253_s1 + $0x60] sm:$0xff]  ;;  %v25_v8 = vld [vmem:[%s253_s1 + $0x58] sm:$0xff]  ;;  %v24_v10 = vld [vmem:[%s253_s1 + $0x50] sm:$0xff] }
   0x4   :  { %47 = vmatpush.msra.mxu0 %v28_v2  ;;  %v42_v7 = vld [vmem:[%s253_s1 + $0xe0] sm:$0xff]  ;;  %v41_v9 = vld [vmem:[%s253_s1 + $0xd8] sm:$0xff]  ;;  %v40_v11 = vld [vmem:[%s253_s1 + $0xd0] sm:$0xff] }
   0x5   :  { %67 = vmatpush.msra.mxu1 %v44_v3  ;;  %v23_v12 = vld [vmem:[%s253_s1 + $0x48] sm:$0xff] }
   0x6   :  { %48 = vmatpush.msra.mxu0 %v27_v4  ;;  %v39_v13 = vld [vmem:[%s253_s1 + $0xc8] sm:$0xff] }
   0x7   :  { %68 = vmatpush.msra.mxu1 %v43_v5 }
   0x8   :  { %49 = vmatpush.msra.mxu0 %v26_v6 }
   0x9   :  { %69 = vmatpush.msra.mxu1 %v42_v7 }
   0xa   :  { %50 = vmatpush.msra.mxu0 %v25_v8 }
   0xb   :  { %70 = vmatpush.msra.mxu1 %v41_v9 }
   0xc   :  { %51 = vmatpush.msra.mxu0 %v24_v10 }
   0xd   :  { %71 = vmatpush.msra.mxu1 %v40_v11 }
   0xe   :  { %7 = vsyncpa [#allocation3], 0  ;;  %v22_v14 = vld [vmem:[%s253_s1 + $0x40] sm:$0xff]  ;;  %52 = vmatpush.msra.mxu0 %v23_v12  ;;  %v21_v16 = vld [vmem:[%s253_s1 + $0x38] sm:$0xff]  ;;  %s131_s21 = smov [#allocation2]   ;;  %vm86_vm0 = vcmask 523264  }
   0xf   :  { %v38_v15 = vld [vmem:[%s253_s1 + $0xc0] sm:$0xff]  ;;  %72 = vmatpush.msra.mxu1 %v39_v13  ;;  %v37_v17 = vld [vmem:[%s253_s1 + $0xb8] sm:$0xff]  ;;  %v20_v18 = vld [vmem:[%s253_s1 + $0x30] sm:$0xff]  ;;  %s93_s22 = sshll.u32 %s131_s21, 4  ;;  %s94_s22 = int_to_ptr.vmem [resolvable:$true] %s93_s22 }
  0x10   :  { %53 = vmatpush.msra.mxu0 %v22_v14  ;;  %v36_v19 = vld [vmem:[%s253_s1 + $0xb0] sm:$0xff]  ;;  %v19_v20 = vld [vmem:[%s253_s1 + $0x28] sm:$0xff]  ;;  %v18_v22 = vld [vmem:[%s253_s1 + $0x20] sm:$0xff] }
  0x11   :  { %73 = vmatpush.msra.mxu1 %v38_v15  ;;  %v35_v21 = vld [vmem:[%s253_s1 + $0xa8] sm:$0xff]  ;;  %v34_v23 = vld [vmem:[%s253_s1 + $0xa0] sm:$0xff]  ;;  %v17_v24 = vld [vmem:[%s253_s1 + $0x18] sm:$0xff] }
  0x12   :  { %54 = vmatpush.msra.mxu0 %v21_v16  ;;  %v33_v25 = vld [vmem:[%s253_s1 + $0x98] sm:$0xff]  ;;  %v16_v26 = vld [vmem:[%s253_s1 + $0x10] sm:$0xff]  ;;  %v15_v28 = vld [vmem:[%s253_s1 + $0x8] sm:$0xff] }
  0x13   :  { %74 = vmatpush.msra.mxu1 %v37_v17  ;;  %v32_v27 = vld [vmem:[%s253_s1 + $0x90] sm:$0xff]  ;;  %v31_v29 = vld [vmem:[%s253_s1 + $0x88] sm:$0xff]  ;;  %v14_v30 = vld [vmem:[%s253_s1] sm:$0xff] }
  0x14   :  { %55 = vmatpush.msra.mxu0 %v20_v18  ;;  %v30_v31 = vld [vmem:[%s253_s1 + $0x80] sm:$0xff]  ;;  %v13_v33 = vld [vmem:[%s252_s0 + $0x8] sm:$0xff]  ;;  %s95_s1 = sshll.u32 %s254_s2, 4  ;;  %s96_s1 = int_to_ptr.hbm [resolvable:$true] %s95_s1 }
  0x15   :  { %75 = vmatpush.msra.mxu1 %v36_v19  ;;  %v12_v32 = vld [vmem:[%s252_s0] sm:$0xff] }
  0x16   :  { %56 = vmatpush.msra.mxu0 %v19_v20 }
  0x17   :  { %76 = vmatpush.msra.mxu1 %v35_v21 }
  0x18   :  { %57 = vmatpush.msra.mxu0 %v18_v22 }
  0x19   :  { %77 = vmatpush.msra.mxu1 %v34_v23 }
  0x1a   :  { %58 = vmatpush.msra.mxu0 %v17_v24 }
  0x1b   :  { %78 = vmatpush.msra.mxu1 %v33_v25 }
  0x1c   :  { %59 = vmatpush.msra.mxu0 %v16_v26 }
  0x1d   :  { %79 = vmatpush.msra.mxu1 %v32_v27 }
  0x1e   :  { %60 = vmatpush.msra.mxu0 %v15_v28 }
  0x1f   :  { %80 = vmatpush.msra.mxu1 %v31_v29 }
  0x20   :  { %61 = vmatpush.msra.mxu0 %v14_v30 }
  0x21   :  { %81 = vmatpush.msra.mxu1 %v30_v31  ;;  %62 = vmatmul.f32.vlgmr.msra.gmra.mxu0 %v12_v32 }
  0x22   :  { %82 = vmatmul.f32.vlgmr.msra.gmra.mxu1 %v13_v33 }
  0x9e   :  { %v63_v34 = vpop.f32.mrf.mxu0 }
  0x9f   :  { %v83_v35 = vpop.f32.mrf.mxu1 }
  0xa0   :  { %v84_v36 = vadd.f32 %v83_v35, %v63_v34 }
  0xa2   :  { %87 = vst.msk [vmem:[#allocation2] sm:$0xff] %vm86_vm0, %v84_v36 }
  0xa3   :  { %98 = dma.vmem_to_hbm [thread:$0]  %s94_s22, 128, %s96_s1, [#allocation3]  }
  0xa4   :  { %129 = dma.done.wait [#allocation3], 128  }
  0xa5   :  { %130 = vsyncadd [#allocation3], 4294967168 }
  0xa6   :  { %103 = vsyncpa [#allocation3], 1 }

</bundles_post_ra>
